<compile_context>
chip_gen: v5e
topology: v5e:2x2
jax: 0.10.0
libtpu: 0.0.40
codegen_flags: <defaults>
</compile_context>

<pallas_src>
import jax
import jax.numpy as jnp
from jax.experimental import pallas as pl
from jax.experimental.pallas import tpu as pltpu

# Problem size consistent with the module (stride=1, downsample=None,
# in_channel == out_channel so the identity add is well defined).
N, C, H, W = 2, 4, 16, 16
HW = H * W
KH = KW = 3
K = KH * KW * C          # im2col contraction size = 36
OFF = 128                # lane offset of the image inside the padded row buffer
GL = 512                 # row-buffer length (needs >= OFF + HW + W + 1 = 401)
EPS = 1e-5


def basic_block_kernel(x_ref, w_ref, b_ref, o_ref, g_ref, pt_ref):
    """Shapes:
       x_ref: (1, C, HW)   input image, lane-dense
       w_ref: (2, C, K)    BN-scaled conv weights for conv1/conv2
       b_ref: (2, C, 1)    folded BN biases
       o_ref: (1, C, HW)   output image
       g_ref: (C, GL)      zero-padded row buffer (VMEM scratch)
       pt_ref:(K, HW)      im2col patch matrix   (VMEM scratch)
    """
    x_img = x_ref[0]                                            # (C, HW)

    # lane index -> w coordinate, used to mask the out-of-row conv taps
    col = jax.lax.broadcasted_iota(jnp.int32, (C, HW), 1) % W

    # Zero the halo every grid step: with a "parallel" grid the two images may
    # run on different TensorCores (v7x), so no cross-step scratch state is assumed.
    g_ref[...] = jnp.zeros_like(g_ref)

    def conv3x3(src, w_mat):
        # src: (C, HW) activation; w_mat: (C, K) BN-scaled weights -> (C, HW) f32.
        g_ref[:, OFF:OFF + HW] = src                            # image interior
        for dh in range(KH):
            for dw in range(KW):
                t = dh * KW + dw
                delta = (dh - 1) * W + (dw - 1)
                tap = g_ref[:, OFF + delta:OFF + delta + HW]    # (C, HW) shifted view
                if dw == 0:                # reads column w-1: invalid at w == 0
                    tap = jnp.where(col > 0, tap, 0.0)
                elif dw == KW - 1:         # reads column w+1: invalid at w == W-1
                    tap = jnp.where(col < W - 1, tap, 0.0)
                # rows (dh, dw, ci) of the patch matrix
                pt_ref[t * C:(t + 1) * C, :] = tap
        # single im2col matmul on the MXU: (C, 36) @ (36, 256)
        return jnp.dot(w_mat, pt_ref[...], preferred_element_type=jnp.float32)

    # conv1 -> bn1 -> relu   (BN scale folded into w; only the bias add remains)
    h1 = jnp.maximum(conv3x3(x_img, w_ref[0]) + b_ref[0], 0.0)
    # conv2 -> bn2 -> +identity -> relu
    h2 = conv3x3(h1, w_ref[1]) + b_ref[1] + x_img
    o_ref[...] = jnp.maximum(h2, 0.0).reshape(1, C, HW)


def _fold_conv_bn(w_oihw, gamma, beta, mean, var):
    """Fold inference-mode BN into the conv: returns ((C, 9*C) weights, (C, 1) bias)."""
    scale = gamma / jnp.sqrt(var + EPS)                         # (Cout,)
    bias = beta - mean * scale                                  # (Cout,)
    # (Cout, Cin, KH, KW) -> (Cout, KH, KW, Cin) -> (Cout, 9*Cin); this row
    # ordering (dh, dw, ci) matches the patch matrix built in the kernel.
    w_mat = jnp.transpose(w_oihw, (0, 2, 3, 1)).reshape(C, K) * scale[:, None]
    return w_mat, bias.reshape(C, 1)


def basic_block_forward(x_nchw, params):
    """Pallas implementation of BasicBlock.forward (stride=1, downsample=None)."""
    x = x_nchw.astype(jnp.float32).reshape(N, C, HW)            # lane-dense, no transpose
    w1_mat, b1_vec = _fold_conv_bn(params["w1"], params["g1"], params["b1"],
                                   params["m1"], params["v1"])
    w2_mat, b2_vec = _fold_conv_bn(params["w2"], params["g2"], params["b2"],
                                   params["m2"], params["v2"])
    w = jnp.stack([w1_mat, w2_mat])                             # (2, C, K)
    b = jnp.stack([b1_vec, b2_vec])                             # (2, C, 1)

    out = pl.pallas_call(
        basic_block_kernel,
        out_shape=jax.ShapeDtypeStruct((N, C, HW), jnp.float32),
        grid_spec=pltpu.PrefetchScalarGridSpec(
            num_scalar_prefetch=0,
            grid=(N,),
            in_specs=[
                pl.BlockSpec((1, C, HW), lambda i: (i, 0, 0)),   # image i
                pl.BlockSpec((2, C, K), lambda i: (0, 0, 0)),    # both conv weights
                pl.BlockSpec((2, C, 1), lambda i: (0, 0, 0)),    # both BN biases
            ],
            out_specs=pl.BlockSpec((1, C, HW), lambda i: (i, 0, 0)),
            scratch_shapes=[
                pltpu.VMEM((C, GL), jnp.float32),                # padded row buffer
                pltpu.VMEM((K, HW), jnp.float32),                # im2col patches
            ],
        ),
        compiler_params=pltpu.CompilerParams(
            dimension_semantics=("parallel",)),                  # both TCs on v7x
    )(x, w, b)
    return out.reshape(N, C, H, W)


def basic_block_reference(x_nchw, params):
    """Plain-JAX reference (unfolded conv + explicit BN) for correctness."""
    x = x_nchw.astype(jnp.float32)

    def conv(inp, w_oihw):
        return jax.lax.conv_general_dilated(
            inp, w_oihw, window_strides=(1, 1), padding="SAME",
            dimension_numbers=("NCHW", "OIHW", "NCHW"))

    def bn(h, g, b, m, v):
        inv = (g / jnp.sqrt(v + EPS))[None, :, None, None]
        return (h - m[None, :, None, None]) * inv + b[None, :, None, None]

    h = jnp.maximum(bn(conv(x, params["w1"]), params["g1"], params["b1"],
                       params["m1"], params["v1"]), 0.0)
    h = bn(conv(h, params["w2"]), params["g2"], params["b2"],
           params["m2"], params["v2"]) + x
    return jnp.maximum(h, 0.0)


def make_params(key):
    ks = jax.random.split(key, 6)
    return {
        # conv weights in PyTorch OIHW layout
        "w1": 0.1 * jax.random.normal(ks[0], (C, C, KH, KW), jnp.float32),
        "w2": 0.1 * jax.random.normal(ks[1], (C, C, KH, KW), jnp.float32),
        # bn1: gamma, beta, running_mean, running_var
        "g1": 1.0 + 0.05 * jax.random.normal(ks[2], (C,), jnp.float32),
        "b1": 0.05 * jax.random.normal(ks[3], (C,), jnp.float32),
        "m1": jnp.linspace(-0.1, 0.1, C, dtype=jnp.float32),
        "v1": jnp.linspace(0.9, 1.1, C, dtype=jnp.float32),
        # bn2
        "g2": 1.0 + 0.05 * jax.random.normal(ks[4], (C,), jnp.float32),
        "b2": 0.05 * jax.random.normal(ks[5], (C,), jnp.float32),
        "m2": jnp.linspace(0.1, -0.1, C, dtype=jnp.float32),
        "v2": jnp.linspace(1.1, 0.9, C, dtype=jnp.float32),
    }


if __name__ == "__main__":
    key = jax.random.PRNGKey(0)
    k_x, k_p = jax.random.split(key)
    x = jax.random.normal(k_x, (N, C, H, W), jnp.float32)   # PyTorch NCHW input
    params = make_params(k_p)

    out = jax.block_until_ready(basic_block_forward(x, params))
    ref = basic_block_reference(x, params)

    assert out.shape == (N, C, H, W)
    assert jnp.allclose(out, ref, rtol=1e-4, atol=1e-4), "mismatch vs reference"

    print("KERNEL_OK")
</pallas_src>

<mosaic_0001>
module attributes {stable_mosaic.version = 11 : i64} {
  func.func @basic_block_kernel(%arg0: i32, %arg1: memref<1x4x256xf32, #tpu.memory_space<vmem>>, %arg2: memref<2x4x36xf32, #tpu.memory_space<vmem>>, %arg3: memref<2x4x1xf32, #tpu.memory_space<vmem>>, %arg4: memref<1x4x256xf32, #tpu.memory_space<vmem>>, %arg5: memref<4x512xf32, #tpu.memory_space<vmem>>, %arg6: memref<36x256xf32, #tpu.memory_space<vmem>>) attributes {dimension_semantics = [#tpu.dimension_semantics<parallel>], iteration_bounds = array<i64: 2>, scalar_prefetch = 0 : i64, scratch_operands = 2 : i64, tpu.core_type = #tpu.core_type<tc>, window_params = [{transform_indices = @transform_0, window_bounds = array<i64: 1, 4, 256>}, {pipeline_mode = #tpu.pipeline_mode<synchronous>, transform_indices = @transform_1, window_bounds = array<i64: 2, 4, 36>}, {pipeline_mode = #tpu.pipeline_mode<synchronous>, transform_indices = @transform_2, window_bounds = array<i64: 2, 4, 1>}, {transform_indices = @transform_3, window_bounds = array<i64: 1, 4, 256>}]} {
    %c0 = arith.constant 0 : index
    %c0_0 = arith.constant 0 : index
    %c0_1 = arith.constant 0 : index
    %0 = vector.load %arg1[%c0, %c0_0, %c0_1] : memref<1x4x256xf32, #tpu.memory_space<vmem>>, vector<1x4x256xf32>
    %1 = vector.shape_cast %0 : vector<1x4x256xf32> to vector<4x256xf32>
    %2 = tpu.iota {dimensions = array<i32: 1>} : vector<4x256xi32>
    %c16_i32 = arith.constant 16 : i32
    %c0_i32 = arith.constant 0 : i32
    %3 = arith.cmpi eq, %c16_i32, %c0_i32 : i32
    %c1_i32 = arith.constant 1 : i32
    %4 = arith.select %3, %c1_i32, %c16_i32 : i32
    %5 = vector.broadcast %4 : i32 to vector<4x256xi32>
    %6 = arith.remsi %2, %5 : vector<4x256xi32>
    %c0_i32_2 = arith.constant 0 : i32
    %7 = vector.broadcast %c0_i32_2 : i32 to vector<4x256xi32>
    %8 = arith.cmpi ne, %6, %7 : vector<4x256xi32>
    %c0_i32_3 = arith.constant 0 : i32
    %9 = vector.broadcast %c0_i32_3 : i32 to vector<4x256xi32>
    %10 = arith.cmpi slt, %6, %9 : vector<4x256xi32>
    %c0_i32_4 = arith.constant 0 : i32
    %11 = arith.cmpi slt, %4, %c0_i32_4 : i32
    %12 = vector.broadcast %11 : i1 to vector<4x256xi1>
    %13 = vector.broadcast %12 : vector<4x256xi1> to vector<4x256xi1>
    %14 = arith.xori %10, %13 : vector<4x256xi1>
    %15 = arith.andi %14, %8 : vector<4x256xi1>
    %16 = vector.broadcast %4 : i32 to vector<4x256xi32>
    %17 = arith.addi %6, %16 : vector<4x256xi32>
    %18 = arith.select %15, %17, %6 : vector<4x256xi1>, vector<4x256xi32>
    %cst = arith.constant 0.000000e+00 : f32
    %19 = vector.broadcast %cst : f32 to vector<4x512xf32>
    %c0_5 = arith.constant 0 : index
    %c0_6 = arith.constant 0 : index
    %20 = vector.load %arg5[%c0_5, %c0_6] : memref<4x512xf32, #tpu.memory_space<vmem>>, vector<4x512xf32>
    tpu.vector_store %arg5[%c0_5, %c0_6], %19 {strides = array<i32>} : memref<4x512xf32, #tpu.memory_space<vmem>>, vector<4x512xf32>,
    %c0_7 = arith.constant 0 : index
    %c0_8 = arith.constant 0 : index
    %c0_9 = arith.constant 0 : index
    %21 = vector.load %arg2[%c0_7, %c0_8, %c0_9] : memref<2x4x36xf32, #tpu.memory_space<vmem>>, vector<1x4x36xf32>
    %22 = vector.shape_cast %21 : vector<1x4x36xf32> to vector<4x36xf32>
    %c0_10 = arith.constant 0 : index
    %c128 = arith.constant 128 : index
    %23 = vector.load %arg5[%c0_10, %c128] : memref<4x512xf32, #tpu.memory_space<vmem>>, vector<4x256xf32>
    tpu.vector_store %arg5[%c0_10, %c128], %1 {strides = array<i32>} : memref<4x512xf32, #tpu.memory_space<vmem>>, vector<4x256xf32>,
    %c0_11 = arith.constant 0 : index
    %c111 = arith.constant 111 : index
    %24 = vector.load %arg5[%c0_11, %c111] : memref<4x512xf32, #tpu.memory_space<vmem>>, vector<4x256xf32>
    %c0_i32_12 = arith.constant 0 : i32
    %25 = vector.broadcast %c0_i32_12 : i32 to vector<4x256xi32>
    %26 = arith.cmpi sgt, %18, %25 : vector<4x256xi32>
    %cst_13 = arith.constant 0.000000e+00 : f32
    %27 = vector.broadcast %cst_13 : f32 to vector<4x256xf32>
    %28 = arith.select %26, %24, %27 : vector<4x256xi1>, vector<4x256xf32>
    %c0_14 = arith.constant 0 : index
    %c0_15 = arith.constant 0 : index
    %29 = vector.load %arg6[%c0_14, %c0_15] : memref<36x256xf32, #tpu.memory_space<vmem>>, vector<4x256xf32>
    tpu.vector_store %arg6[%c0_14, %c0_15], %28 {strides = array<i32>} : memref<36x256xf32, #tpu.memory_space<vmem>>, vector<4x256xf32>,
    %c0_16 = arith.constant 0 : index
    %c112 = arith.constant 112 : index
    %30 = vector.load %arg5[%c0_16, %c112] : memref<4x512xf32, #tpu.memory_space<vmem>>, vector<4x256xf32>
    %c4 = arith.constant 4 : index
    %c0_17 = arith.constant 0 : index
    %31 = vector.load %arg6[%c4, %c0_17] : memref<36x256xf32, #tpu.memory_space<vmem>>, vector<4x256xf32>
    tpu.vector_store %arg6[%c4, %c0_17], %30 {strides = array<i32>} : memref<36x256xf32, #tpu.memory_space<vmem>>, vector<4x256xf32>,
    %c0_18 = arith.constant 0 : index
    %c113 = arith.constant 113 : index
    %32 = vector.load %arg5[%c0_18, %c113] : memref<4x512xf32, #tpu.memory_space<vmem>>, vector<4x256xf32>
    %c15_i32 = arith.constant 15 : i32
    %33 = vector.broadcast %c15_i32 : i32 to vector<4x256xi32>
    %34 = arith.cmpi slt, %18, %33 : vector<4x256xi32>
    %cst_19 = arith.constant 0.000000e+00 : f32
    %35 = vector.broadcast %cst_19 : f32 to vector<4x256xf32>
    %36 = arith.select %34, %32, %35 : vector<4x256xi1>, vector<4x256xf32>
    %c8 = arith.constant 8 : index
    %c0_20 = arith.constant 0 : index
    %37 = vector.load %arg6[%c8, %c0_20] : memref<36x256xf32, #tpu.memory_space<vmem>>, vector<4x256xf32>
    tpu.vector_store %arg6[%c8, %c0_20], %36 {strides = array<i32>} : memref<36x256xf32, #tpu.memory_space<vmem>>, vector<4x256xf32>,
    %c0_21 = arith.constant 0 : index
    %c127 = arith.constant 127 : index
    %38 = vector.load %arg5[%c0_21, %c127] : memref<4x512xf32, #tpu.memory_space<vmem>>, vector<4x256xf32>
    %c0_i32_22 = arith.constant 0 : i32
    %39 = vector.broadcast %c0_i32_22 : i32 to vector<4x256xi32>
    %40 = arith.cmpi sgt, %18, %39 : vector<4x256xi32>
    %cst_23 = arith.constant 0.000000e+00 : f32
    %41 = vector.broadcast %cst_23 : f32 to vector<4x256xf32>
    %42 = arith.select %40, %38, %41 : vector<4x256xi1>, vector<4x256xf32>
    %c12 = arith.constant 12 : index
    %c0_24 = arith.constant 0 : index
    %43 = vector.load %arg6[%c12, %c0_24] : memref<36x256xf32, #tpu.memory_space<vmem>>, vector<4x256xf32>
    tpu.vector_store %arg6[%c12, %c0_24], %42 {strides = array<i32>} : memref<36x256xf32, #tpu.memory_space<vmem>>, vector<4x256xf32>,
    %c0_25 = arith.constant 0 : index
    %c128_26 = arith.constant 128 : index
    %44 = vector.load %arg5[%c0_25, %c128_26] : memref<4x512xf32, #tpu.memory_space<vmem>>, vector<4x256xf32>
    %c16 = arith.constant 16 : index
    %c0_27 = arith.constant 0 : index
    %45 = vector.load %arg6[%c16, %c0_27] : memref<36x256xf32, #tpu.memory_space<vmem>>, vector<4x256xf32>
    tpu.vector_store %arg6[%c16, %c0_27], %44 {strides = array<i32>} : memref<36x256xf32, #tpu.memory_space<vmem>>, vector<4x256xf32>,
    %c0_28 = arith.constant 0 : index
    %c129 = arith.constant 129 : index
    %46 = vector.load %arg5[%c0_28, %c129] : memref<4x512xf32, #tpu.memory_space<vmem>>, vector<4x256xf32>
    %c15_i32_29 = arith.constant 15 : i32
    %47 = vector.broadcast %c15_i32_29 : i32 to vector<4x256xi32>
    %48 = arith.cmpi slt, %18, %47 : vector<4x256xi32>
    %cst_30 = arith.constant 0.000000e+00 : f32
    %49 = vector.broadcast %cst_30 : f32 to vector<4x256xf32>
    %50 = arith.select %48, %46, %49 : vector<4x256xi1>, vector<4x256xf32>
    %c20 = arith.constant 20 : index
    %c0_31 = arith.constant 0 : index
    %51 = vector.load %arg6[%c20, %c0_31] : memref<36x256xf32, #tpu.memory_space<vmem>>, vector<4x256xf32>
    tpu.vector_store %arg6[%c20, %c0_31], %50 {strides = array<i32>} : memref<36x256xf32, #tpu.memory_space<vmem>>, vector<4x256xf32>,
    %c0_32 = arith.constant 0 : index
    %c143 = arith.constant 143 : index
    %52 = vector.load %arg5[%c0_32, %c143] : memref<4x512xf32, #tpu.memory_space<vmem>>, vector<4x256xf32>
    %c0_i32_33 = arith.constant 0 : i32
    %53 = vector.broadcast %c0_i32_33 : i32 to vector<4x256xi32>
    %54 = arith.cmpi sgt, %18, %53 : vector<4x256xi32>
    %cst_34 = arith.constant 0.000000e+00 : f32
    %55 = vector.broadcast %cst_34 : f32 to vector<4x256xf32>
    %56 = arith.select %54, %52, %55 : vector<4x256xi1>, vector<4x256xf32>
    %c24 = arith.constant 24 : index
    %c0_35 = arith.constant 0 : index
    %57 = vector.load %arg6[%c24, %c0_35] : memref<36x256xf32, #tpu.memory_space<vmem>>, vector<4x256xf32>
    tpu.vector_store %arg6[%c24, %c0_35], %56 {strides = array<i32>} : memref<36x256xf32, #tpu.memory_space<vmem>>, vector<4x256xf32>,
    %c0_36 = arith.constant 0 : index
    %c144 = arith.constant 144 : index
    %58 = vector.load %arg5[%c0_36, %c144] : memref<4x512xf32, #tpu.memory_space<vmem>>, vector<4x256xf32>
    %c28 = arith.constant 28 : index
    %c0_37 = arith.constant 0 : index
    %59 = vector.load %arg6[%c28, %c0_37] : memref<36x256xf32, #tpu.memory_space<vmem>>, vector<4x256xf32>
    tpu.vector_store %arg6[%c28, %c0_37], %58 {strides = array<i32>} : memref<36x256xf32, #tpu.memory_space<vmem>>, vector<4x256xf32>,
    %c0_38 = arith.constant 0 : index
    %c145 = arith.constant 145 : index
    %60 = vector.load %arg5[%c0_38, %c145] : memref<4x512xf32, #tpu.memory_space<vmem>>, vector<4x256xf32>
    %c15_i32_39 = arith.constant 15 : i32
    %61 = vector.broadcast %c15_i32_39 : i32 to vector<4x256xi32>
    %62 = arith.cmpi slt, %18, %61 : vector<4x256xi32>
    %cst_40 = arith.constant 0.000000e+00 : f32
    %63 = vector.broadcast %cst_40 : f32 to vector<4x256xf32>
    %64 = arith.select %62, %60, %63 : vector<4x256xi1>, vector<4x256xf32>
    %c32 = arith.constant 32 : index
    %c0_41 = arith.constant 0 : index
    %65 = vector.load %arg6[%c32, %c0_41] : memref<36x256xf32, #tpu.memory_space<vmem>>, vector<4x256xf32>
    tpu.vector_store %arg6[%c32, %c0_41], %64 {strides = array<i32>} : memref<36x256xf32, #tpu.memory_space<vmem>>, vector<4x256xf32>,
    %c0_42 = arith.constant 0 : index
    %c0_43 = arith.constant 0 : index
    %66 = vector.load %arg6[%c0_42, %c0_43] : memref<36x256xf32, #tpu.memory_space<vmem>>, vector<36x256xf32>
    %cst_44 = arith.constant dense<0.000000e+00> : vector<4x256xf32>
    %67 = tpu.matmul %22, %66, %cst_44 {dimension_numbers = #tpu.dot_dimension_numbers<[1], [0], [0], [1], [0, 0, 1, 1], [], []>} : vector<4x36xf32>, vector<36x256xf32>, vector<4x256xf32> -> vector<4x256xf32>
    %c0_45 = arith.constant 0 : index
    %c0_46 = arith.constant 0 : index
    %c0_47 = arith.constant 0 : index
    %68 = vector.load %arg3[%c0_45, %c0_46, %c0_47] : memref<2x4x1xf32, #tpu.memory_space<vmem>>, vector<1x4x1xf32>
    %69 = vector.shape_cast %68 : vector<1x4x1xf32> to vector<4x1xf32>
    %70 = vector.broadcast %69 : vector<4x1xf32> to vector<4x256xf32>
    %71 = arith.addf %67, %70 : vector<4x256xf32>
    %cst_48 = arith.constant 0.000000e+00 : f32
    %72 = vector.broadcast %cst_48 : f32 to vector<4x256xf32>
    %73 = arith.maximumf %71, %72 : vector<4x256xf32>
    %c1 = arith.constant 1 : index
    %c0_49 = arith.constant 0 : index
    %c0_50 = arith.constant 0 : index
    %74 = vector.load %arg2[%c1, %c0_49, %c0_50] : memref<2x4x36xf32, #tpu.memory_space<vmem>>, vector<1x4x36xf32>
    %75 = vector.shape_cast %74 : vector<1x4x36xf32> to vector<4x36xf32>
    %c0_51 = arith.constant 0 : index
    %c128_52 = arith.constant 128 : index
    %76 = vector.load %arg5[%c0_51, %c128_52] : memref<4x512xf32, #tpu.memory_space<vmem>>, vector<4x256xf32>
    tpu.vector_store %arg5[%c0_51, %c128_52], %73 {strides = array<i32>} : memref<4x512xf32, #tpu.memory_space<vmem>>, vector<4x256xf32>,
    %c0_53 = arith.constant 0 : index
    %c111_54 = arith.constant 111 : index
    %77 = vector.load %arg5[%c0_53, %c111_54] : memref<4x512xf32, #tpu.memory_space<vmem>>, vector<4x256xf32>
    %c0_i32_55 = arith.constant 0 : i32
    %78 = vector.broadcast %c0_i32_55 : i32 to vector<4x256xi32>
    %79 = arith.cmpi sgt, %18, %78 : vector<4x256xi32>
    %cst_56 = arith.constant 0.000000e+00 : f32
    %80 = vector.broadcast %cst_56 : f32 to vector<4x256xf32>
    %81 = arith.select %79, %77, %80 : vector<4x256xi1>, vector<4x256xf32>
    %c0_57 = arith.constant 0 : index
    %c0_58 = arith.constant 0 : index
    %82 = vector.load %arg6[%c0_57, %c0_58] : memref<36x256xf32, #tpu.memory_space<vmem>>, vector<4x256xf32>
    tpu.vector_store %arg6[%c0_57, %c0_58], %81 {strides = array<i32>} : memref<36x256xf32, #tpu.memory_space<vmem>>, vector<4x256xf32>,
    %c0_59 = arith.constant 0 : index
    %c112_60 = arith.constant 112 : index
    %83 = vector.load %arg5[%c0_59, %c112_60] : memref<4x512xf32, #tpu.memory_space<vmem>>, vector<4x256xf32>
    %c4_61 = arith.constant 4 : index
    %c0_62 = arith.constant 0 : index
    %84 = vector.load %arg6[%c4_61, %c0_62] : memref<36x256xf32, #tpu.memory_space<vmem>>, vector<4x256xf32>
    tpu.vector_store %arg6[%c4_61, %c0_62], %83 {strides = array<i32>} : memref<36x256xf32, #tpu.memory_space<vmem>>, vector<4x256xf32>,
    %c0_63 = arith.constant 0 : index
    %c113_64 = arith.constant 113 : index
    %85 = vector.load %arg5[%c0_63, %c113_64] : memref<4x512xf32, #tpu.memory_space<vmem>>, vector<4x256xf32>
    %c15_i32_65 = arith.constant 15 : i32
    %86 = vector.broadcast %c15_i32_65 : i32 to vector<4x256xi32>
    %87 = arith.cmpi slt, %18, %86 : vector<4x256xi32>
    %cst_66 = arith.constant 0.000000e+00 : f32
    %88 = vector.broadcast %cst_66 : f32 to vector<4x256xf32>
    %89 = arith.select %87, %85, %88 : vector<4x256xi1>, vector<4x256xf32>
    %c8_67 = arith.constant 8 : index
    %c0_68 = arith.constant 0 : index
    %90 = vector.load %arg6[%c8_67, %c0_68] : memref<36x256xf32, #tpu.memory_space<vmem>>, vector<4x256xf32>
    tpu.vector_store %arg6[%c8_67, %c0_68], %89 {strides = array<i32>} : memref<36x256xf32, #tpu.memory_space<vmem>>, vector<4x256xf32>,
    %c0_69 = arith.constant 0 : index
    %c127_70 = arith.constant 127 : index
    %91 = vector.load %arg5[%c0_69, %c127_70] : memref<4x512xf32, #tpu.memory_space<vmem>>, vector<4x256xf32>
    %c0_i32_71 = arith.constant 0 : i32
    %92 = vector.broadcast %c0_i32_71 : i32 to vector<4x256xi32>
    %93 = arith.cmpi sgt, %18, %92 : vector<4x256xi32>
    %cst_72 = arith.constant 0.000000e+00 : f32
    %94 = vector.broadcast %cst_72 : f32 to vector<4x256xf32>
    %95 = arith.select %93, %91, %94 : vector<4x256xi1>, vector<4x256xf32>
    %c12_73 = arith.constant 12 : index
    %c0_74 = arith.constant 0 : index
    %96 = vector.load %arg6[%c12_73, %c0_74] : memref<36x256xf32, #tpu.memory_space<vmem>>, vector<4x256xf32>
    tpu.vector_store %arg6[%c12_73, %c0_74], %95 {strides = array<i32>} : memref<36x256xf32, #tpu.memory_space<vmem>>, vector<4x256xf32>,
    %c0_75 = arith.constant 0 : index
    %c128_76 = arith.constant 128 : index
    %97 = vector.load %arg5[%c0_75, %c128_76] : memref<4x512xf32, #tpu.memory_space<vmem>>, vector<4x256xf32>
    %c16_77 = arith.constant 16 : index
    %c0_78 = arith.constant 0 : index
    %98 = vector.load %arg6[%c16_77, %c0_78] : memref<36x256xf32, #tpu.memory_space<vmem>>, vector<4x256xf32>
    tpu.vector_store %arg6[%c16_77, %c0_78], %97 {strides = array<i32>} : memref<36x256xf32, #tpu.memory_space<vmem>>, vector<4x256xf32>,
    %c0_79 = arith.constant 0 : index
    %c129_80 = arith.constant 129 : index
    %99 = vector.load %arg5[%c0_79, %c129_80] : memref<4x512xf32, #tpu.memory_space<vmem>>, vector<4x256xf32>
    %c15_i32_81 = arith.constant 15 : i32
    %100 = vector.broadcast %c15_i32_81 : i32 to vector<4x256xi32>
    %101 = arith.cmpi slt, %18, %100 : vector<4x256xi32>
    %cst_82 = arith.constant 0.000000e+00 : f32
    %102 = vector.broadcast %cst_82 : f32 to vector<4x256xf32>
    %103 = arith.select %101, %99, %102 : vector<4x256xi1>, vector<4x256xf32>
    %c20_83 = arith.constant 20 : index
    %c0_84 = arith.constant 0 : index
    %104 = vector.load %arg6[%c20_83, %c0_84] : memref<36x256xf32, #tpu.memory_space<vmem>>, vector<4x256xf32>
    tpu.vector_store %arg6[%c20_83, %c0_84], %103 {strides = array<i32>} : memref<36x256xf32, #tpu.memory_space<vmem>>, vector<4x256xf32>,
    %c0_85 = arith.constant 0 : index
    %c143_86 = arith.constant 143 : index
    %105 = vector.load %arg5[%c0_85, %c143_86] : memref<4x512xf32, #tpu.memory_space<vmem>>, vector<4x256xf32>
    %c0_i32_87 = arith.constant 0 : i32
    %106 = vector.broadcast %c0_i32_87 : i32 to vector<4x256xi32>
    %107 = arith.cmpi sgt, %18, %106 : vector<4x256xi32>
    %cst_88 = arith.constant 0.000000e+00 : f32
    %108 = vector.broadcast %cst_88 : f32 to vector<4x256xf32>
    %109 = arith.select %107, %105, %108 : vector<4x256xi1>, vector<4x256xf32>
    %c24_89 = arith.constant 24 : index
    %c0_90 = arith.constant 0 : index
    %110 = vector.load %arg6[%c24_89, %c0_90] : memref<36x256xf32, #tpu.memory_space<vmem>>, vector<4x256xf32>
    tpu.vector_store %arg6[%c24_89, %c0_90], %109 {strides = array<i32>} : memref<36x256xf32, #tpu.memory_space<vmem>>, vector<4x256xf32>,
    %c0_91 = arith.constant 0 : index
    %c144_92 = arith.constant 144 : index
    %111 = vector.load %arg5[%c0_91, %c144_92] : memref<4x512xf32, #tpu.memory_space<vmem>>, vector<4x256xf32>
    %c28_93 = arith.constant 28 : index
    %c0_94 = arith.constant 0 : index
    %112 = vector.load %arg6[%c28_93, %c0_94] : memref<36x256xf32, #tpu.memory_space<vmem>>, vector<4x256xf32>
    tpu.vector_store %arg6[%c28_93, %c0_94], %111 {strides = array<i32>} : memref<36x256xf32, #tpu.memory_space<vmem>>, vector<4x256xf32>,
    %c0_95 = arith.constant 0 : index
    %c145_96 = arith.constant 145 : index
    %113 = vector.load %arg5[%c0_95, %c145_96] : memref<4x512xf32, #tpu.memory_space<vmem>>, vector<4x256xf32>
    %c15_i32_97 = arith.constant 15 : i32
    %114 = vector.broadcast %c15_i32_97 : i32 to vector<4x256xi32>
    %115 = arith.cmpi slt, %18, %114 : vector<4x256xi32>
    %cst_98 = arith.constant 0.000000e+00 : f32
    %116 = vector.broadcast %cst_98 : f32 to vector<4x256xf32>
    %117 = arith.select %115, %113, %116 : vector<4x256xi1>, vector<4x256xf32>
    %c32_99 = arith.constant 32 : index
    %c0_100 = arith.constant 0 : index
    %118 = vector.load %arg6[%c32_99, %c0_100] : memref<36x256xf32, #tpu.memory_space<vmem>>, vector<4x256xf32>
    tpu.vector_store %arg6[%c32_99, %c0_100], %117 {strides = array<i32>} : memref<36x256xf32, #tpu.memory_space<vmem>>, vector<4x256xf32>,
    %c0_101 = arith.constant 0 : index
    %c0_102 = arith.constant 0 : index
    %119 = vector.load %arg6[%c0_101, %c0_102] : memref<36x256xf32, #tpu.memory_space<vmem>>, vector<36x256xf32>
    %cst_103 = arith.constant dense<0.000000e+00> : vector<4x256xf32>
    %120 = tpu.matmul %75, %119, %cst_103 {dimension_numbers = #tpu.dot_dimension_numbers<[1], [0], [0], [1], [0, 0, 1, 1], [], []>} : vector<4x36xf32>, vector<36x256xf32>, vector<4x256xf32> -> vector<4x256xf32>
    %c1_104 = arith.constant 1 : index
    %c0_105 = arith.constant 0 : index
    %c0_106 = arith.constant 0 : index
    %121 = vector.load %arg3[%c1_104, %c0_105, %c0_106] : memref<2x4x1xf32, #tpu.memory_space<vmem>>, vector<1x4x1xf32>
    %122 = vector.shape_cast %121 : vector<1x4x1xf32> to vector<4x1xf32>
    %123 = vector.broadcast %122 : vector<4x1xf32> to vector<4x256xf32>
    %124 = arith.addf %120, %123 : vector<4x256xf32>
    %125 = arith.addf %124, %1 : vector<4x256xf32>
    %cst_107 = arith.constant 0.000000e+00 : f32
    %126 = vector.broadcast %cst_107 : f32 to vector<4x256xf32>
    %127 = arith.maximumf %125, %126 : vector<4x256xf32>
    %128 = vector.shape_cast %127 : vector<4x256xf32> to vector<1x4x256xf32>
    %c0_108 = arith.constant 0 : index
    %c0_109 = arith.constant 0 : index
    %c0_110 = arith.constant 0 : index
    %129 = vector.load %arg4[%c0_108, %c0_109, %c0_110] : memref<1x4x256xf32, #tpu.memory_space<vmem>>, vector<1x4x256xf32>
    tpu.vector_store %arg4[%c0_108, %c0_109, %c0_110], %128 {strides = array<i32>} : memref<1x4x256xf32, #tpu.memory_space<vmem>>, vector<1x4x256xf32>,
    return
  }
  func.func @transform_0(%arg0: i32) -> (i32, i32, i32) {
    %c0_i32 = arith.constant 0 : i32
    %c0_i32_0 = arith.constant 0 : i32
    %c0_i32_1 = arith.constant 0 : i32
    return %arg0, %c0_i32, %c0_i32_0 : i32, i32, i32
  }
  func.func @transform_1(%arg0: i32) -> (i32, i32, i32) {
    %c0_i32 = arith.constant 0 : i32
    %c0_i32_0 = arith.constant 0 : i32
    %c0_i32_1 = arith.constant 0 : i32
    %c0_i32_2 = arith.constant 0 : i32
    return %c0_i32, %c0_i32_0, %c0_i32_1 : i32, i32, i32
  }
  func.func @transform_2(%arg0: i32) -> (i32, i32, i32) {
    %c0_i32 = arith.constant 0 : i32
    %c0_i32_0 = arith.constant 0 : i32
    %c0_i32_1 = arith.constant 0 : i32
    %c0_i32_2 = arith.constant 0 : i32
    return %c0_i32, %c0_i32_0, %c0_i32_1 : i32, i32, i32
  }
  func.func @transform_3(%arg0: i32) -> (i32, i32, i32) {
    %c0_i32 = arith.constant 0 : i32
    %c0_i32_0 = arith.constant 0 : i32
    %c0_i32_1 = arith.constant 0 : i32
    return %arg0, %c0_i32, %c0_i32_0 : i32, i32, i32
  }
}

</mosaic_0001>

<bundles_post_ra>
// kernel: tpu_custom_call.1
= control target key start
LH: loop header
LB: loop body
LE: loop exit
PB: predicated region body
PF: predicated region fallthrough
CT: control target
= control target key end

     0   :  { %8 = vsyncpa [#allocation5], 0  ;;  %s1450_s0 = inlined_call_operand.hbm [shape: f32[2,4,256], index: 0, kind: input, shape index: {}]   ;;  %s1451_s1 = inlined_call_operand.vmem [shape: f32[2,4,36], index: 1, kind: input, shape index: {}]   ;;  %s1452_s2 = inlined_call_operand.vmem [shape: f32[2,4,1], index: 2, kind: input, shape index: {}]   ;;  %s1453_s3 = inlined_call_operand.hbm [shape: f32[2,4,256], index: 3, kind: output, shape index: {}]  }
   0x1   :  { %10 = vsyncpa [#allocation5 + $0x1], 0 }
   0x2   :  { %11 = vsyncpa [#allocation6], 0 }
   0x3   :  { %13 = vsyncpa [#allocation6 + $0x1], 0  ;;  %s1113_s12 = smov 0   ;;  %s1115_s13 = smov 0  }
   0x4   :  { %s1117_s14 = smov 0   ;;  %s1119_s15 = smov 0  }
   0x5 LB: > { %s1134_s16 = sadd.s32 4294967295, %s1081_s15   ;;  %s901_s17 = sadd.s32 4294967294, %s1081_s15   ;;  %s1081_s15 = sphi %s1119_s15, %s1471_s15   ;;  %s1077_s14 = sphi %s1117_s14, %s1470_s14   ;;  %s1073_s13 = sphi %s1115_s13, %s1469_s13   ;;  %s1069_s12 = sphi %s1113_s12, %s1468_s12  }
   0x6   : > { %s1138_s18 = sadd.s32 1, %s1081_s15   ;;  %s26_s19 = sadd.s32 1, %s1077_s14 }
   0x7   : > { %s23_s20 = ssub.s32 %s1081_s15, %s1138_s18  ;;  %p33_p0 = scmp.ne.s32.totalorder %s1077_s14, %s1073_s13 }
   0x8   : > { %p24_p1 = scmp.eq.s32.totalorder %s23_s20, 0  ;;  %p34_p2 = scmp.eq.s32.totalorder %s1081_s15, 0 }
   0x9   : > { %p39_p3 = scmp.ne.s32.totalorder %s1073_s13, %s1069_s12  ;;  %p40_p4 = scmp.eq.s32.totalorder %s1134_s16, 0 }
   0xa   : > { %s1150_s21 = scalar_select %p24_p1, %s1077_s14, %s26_s19  }
   0xb   : > { %p1152_p5 = por %p34_p2, %p33_p0  ;;  %p1156_p6 = por %p40_p4, %p39_p3 }
   0xc   : > { %p105_p7 = scmp.eq.s32.totalorder %s1134_s16, 1  ;;  %p111_p8 = scmp.eq.s32.totalorder %s901_s17, 1 }
   0xd   : > { %p939_p10 = scmp.lt.s32.totalorder %s1081_s15, 2  ;;  %s137_s26 = sand.u32 1, %s1077_s14  }
   0xe   : > { %p1163_p11 = por %p105_p7, %p33_p0  ;;  %p1167_p12 = por %p111_p8, %p39_p3 }
   0xf   : > { %s925_s27 = sshll.u32 %s1081_s15, 3  ;;  %s904_s28 = sshll.u32 %s137_s26, 3 }
  0x10   : > { %s146_s4 = scalar_lea.hbm %s1450_s0, %s925_s27  ;;  %s141_s6 = scalar_lea.vmem [#allocation4], %s904_s28 }
  0x11   : > { %s148_s5 = sshll.u32 %s146_s4, 4  ;;  %s150_s7 = sshll.u32 %s141_s6, 4  ;;  %s149_s5 = int_to_ptr.hbm [resolvable:$true] %s148_s5  ;;  %s151_s7 = int_to_ptr.vmem [resolvable:$true] %s150_s7 }
  0x12   : > { %p1178_p13 = pnand %p939_p10, %p1152_p5  ;;  %p907_p0 = scmp.ge.s32.totalorder %s1081_s15, 1 }
  0x13   : > { %p155_p1 = scmp.lt.s32.totalorder %s1081_s15, 3  ;;  %s138_s9 = scalar_lea.sflag [#allocation5], %s137_s26 }
  0x14   : > { %s985_s10 = sshra.s32 %s149_s5, 4  ;;  %p989_p3 = pneg %p1178_p13  ;;  %s986_s10 = int_to_ptr.hbm [resolvable:$true] %s985_s10 }
  0x15   : > { %s987_s11 = scalar_lea.hbm %s986_s10, 8  ;;  %s992_s20 = scalar_lea.hbm %s1450_s0, 16 }
  0x16   : > { %p988_p2 = scmp.ne.s32.totalorder %s986_s10, %s987_s11  ;;  %p993_p5 = scmp.lt.s32.totalorder %s986_s10, %s1450_s0 }
  0x17   : > { %p994_p8 = scmp.lt.s32.totalorder %s992_s20, %s987_s11 }
  0x18   : > { %p990_p4 = pnand %p989_p3, %p988_p2 }
  0x19   : > { %p995_p10 = por %p994_p8, %p993_p5 }
  0x1a   : > { %p991_p7 = pneg %p990_p4 }
  0x1c   : > { %p996_p9 = pnand %p995_p10, %p991_p7 }
  0x1e   : > { %999 = shalt.err (!%p996_p9)
}
  0x1f   : > { %934 = dma.hbm_to_vmem [thread:$0]  (!%p1178_p13), %s149_s5, 128, %s151_s7, %s138_s9  }
  0x20   : > { %p156_p2 = pnand %p907_p0, %p155_p1 }
  0x21   : > { %s1199_s26 = sand.u32 (!%p156_p2), 1, %s1073_s13  }
  0x22   : > { %159 = sbr.rel (%p156_p2) target bundleno = 770 (0x302), region = 32  ;;  %s908_s28 = sshll.u32 (!%p156_p2), %s1199_s26, 3 }
  0x23   : > { %s162_s29 = scalar_lea.sflag (!%p156_p2), [#allocation5], %s1199_s26  ;;  %s165_s30 = scalar_lea.vmem (!%p156_p2), [#allocation4], %s908_s28 }
  0x27   : > { %1060 = dma.done.wait (%p1156_p6), %s162_s29, 128  }
  0x28   : > { %1062 = vsyncadd (%p1156_p6), %s162_s29, 4294967168  ;;  %v1083_v0 = vmov 0.0   ;;  %v1209_v1 = vld [vmem:[%s165_s30] sm:$0xff]  ;;  %s1084_s4 = smov 17   ;;  %s1085_s23 = smov 16   ;;  %v190_v37 = vlaneseq  ;;  %vm239_vm0 = vcmask 138240  }
  0x29   : > { %217 = vst [vmem:[#allocation2] sm:$0xff] %v1083_v0  ;;  %s1086_s5 = smov 15   ;;  %s1087_s6 = smov 1   ;;  %vm290_vm2 = vcmask 121856   ;;  %vm315_vm5 = vcmask 7168   ;;  %vm386_vm7 = vcmask 924672  }
  0x2a   : > { %218 = vst [vmem:[#allocation2 + $0x8] sm:$0xff] %v1083_v0  ;;  %s1088_s7 = smov 113   ;;  %s1089_s8 = smov 127   ;;  %v191_v38 = vand.u32 127, %v190_v37  ;;  %vm355_vm8 = vcmask 1039360   ;;  %vm265_vm9 = vcmask 130048  }
  0x2b   : > { %220 = vst [vmem:[#allocation2 + $0x4] sm:$0xff] %v1209_v1  ;;  %s1090_s9 = smov 111   ;;  %s1091_s10 = smov 112   ;;  %vm412_vm10 = vcmask 916480   ;;  %vm435_vm11 = vcmask 908288   ;;  %vm464_vm12 = vcmask 1043456  }
  0x2c   : > { %v192_v40 = vadd.s32 128, %v191_v38  ;;  %v197_v48 = vand.u32 15, %v191_v38  ;;  %vm460_vm13 = vcmask 293888   ;;  %v915_v43 = vld [vmem:[%s1452_s2 + $0x4] sm:$0xf] }
  0x2e   : > { %v204_v41 = vand.u32 15, %v192_v40  ;;  %vm1262_vm3 = vcmp.lt.s32.totalorder %v197_v48, 15  ;;  %vm1279_vm6 = vcmp.gt.s32.totalorder %v197_v48, 0 }
  0x30   : > { %vm1254_vm1 = vcmp.gt.s32.totalorder %v204_v41, 0  ;;  %vm1266_vm4 = vcmp.lt.s32.totalorder %v204_v41, 15 }
  0x31   : > { %v340_v16 = vld [vmem:[#allocation2 + $0xc] sm:$0xf] }
  0x32   : > { %v222_v2 = vld [vmem:[#allocation2 + $0x8] sm:$0xf]  ;;  %v221_v3 = vld [vmem:[#allocation2] sm:$0xff]  ;;  %v371_v20 = vld [vmem:[#allocation2 + $0xc] sm:$0xf] }
  0x33   : > { %229 = vst [vmem:[#allocation1 + $0x10] ss:$2 sm:$0xff] %v222_v2  ;;  %v249_v5 = vld [vmem:[#allocation2 + $0x8] sm:$0xf]  ;;  %v396_v24 = vld [vmem:[#allocation2 + $0xc] sm:$0xf] }
  0x34   : > { %227 = vst [vmem:[#allocation1] ss:$2 sm:$0xff] %v221_v3  ;;  %v273_v8 = vld [vmem:[#allocation2 + $0x8] sm:$0xf]  ;;  %v420_v28 = vld [vmem:[#allocation2 + $0xc] sm:$0xf] }
  0x35   : > { %v300_v12 = vld [vmem:[#allocation2 + $0x8] sm:$0xf] }
  0x3a   : > { %v232_v4 = vld.sshfl [vmem:[#allocation1 + $0x10] sm:$0xff pattern:$0x75316420] }
  0x3b   : > { %237 = vrot.lane.b32.xlu0 %v232_v4, %s1084_s4  ;;  %v231_v6 = vld.sshfl [vmem:[#allocation1 + $0x8] sm:$0xff pattern:$0x75316420]  ;;  %v1213_v7 = vld.sshfl [vmem:[#allocation1] sm:$0xff pattern:$0x75316420] }
  0x3c   : > { %235 = vrot.lane.b32.xlu2 %v231_v6, %s1084_s4  ;;  %253 = vst [vmem:[#allocation1 + $0x1] ss:$2 sm:$0xff] %v221_v3 }
  0x3d   : > { %255 = vst [vmem:[#allocation1 + $0x11] ss:$2 sm:$0xff] %v249_v5 }
  0x43   : > { %v1216_v9 = vld.sshfl [vmem:[#allocation1] sm:$0xff pattern:$0x75316420]  ;;  %v257_v10 = vld.sshfl [vmem:[#allocation1 + $0x8] sm:$0xff pattern:$0x75316420] }
  0x44   : > { %278 = vst [vmem:[#allocation1] ss:$2 sm:$0xff] %v221_v3  ;;  %v1218_v11 = vld.sshfl [vmem:[#allocation1 + $0x10] sm:$0xff pattern:$0x75316420]  ;;  %261 = vrot.lane.b32.xlu2 %v257_v10, %s1085_s23 }
  0x45   : > { %280 = vst [vmem:[#allocation1 + $0x10] ss:$2 sm:$0xff] %v273_v8 }
  0x4b   : > { %v281_v13 = vld.sshfl [vmem:[#allocation1] sm:$0xff pattern:$0x75316420]  ;;  %v282_v14 = vld.sshfl [vmem:[#allocation1 + $0x8] sm:$0xff pattern:$0x75316420] }
  0x4c   : > { %284 = vrot.lane.b32.xlu1 %v281_v13, %s1086_s5  ;;  %v283_v15 = vld.sshfl [vmem:[#allocation1 + $0x10] sm:$0xff pattern:$0x75316420]  ;;  %303 = vst [vmem:[#allocation1] ss:$2 sm:$0xff] %v221_v3  ;;  %286 = vrot.lane.b32.xlu2 %v282_v14, %s1086_s5 }
  0x4d   : > { %288 = vrot.lane.b32.xlu0 %v283_v15, %s1086_s5  ;;  %305 = vst [vmem:[#allocation1 + $0x10] ss:$2 sm:$0xff] %v300_v12 }
  0x53   : > { %v307_v17 = vld.sshfl [vmem:[#allocation1 + $0x8] sm:$0xff pattern:$0x75316420]  ;;  %v306_v18 = vld.sshfl [vmem:[#allocation1] sm:$0xff pattern:$0x75316420] }
  0x54   : > { %v308_v19 = vld.sshfl [vmem:[#allocation1 + $0x10] sm:$0xff pattern:$0x75316420]  ;;  %332 = vst [vmem:[#allocation1] ss:$2 sm:$0xff] %v1209_v1 }
  0x55   : > { %313 = vrot.lane.b32.xlu1 %v308_v19, %s1087_s6  ;;  %311 = vrot.lane.b32.xlu0 %v307_v17, %s1087_s6  ;;  %345 = vst [vmem:[#allocation1 + $0x10] ss:$2 sm:$0xff] %v340_v16 }
  0x5b   : > { %v333_v21 = vld.sshfl [vmem:[#allocation1] sm:$0xff pattern:$0x75316420]  ;;  %v334_v22 = vld.sshfl [vmem:[#allocation1 + $0x8] sm:$0xff pattern:$0x75316420] }
  0x5c   : > { %v348_v23 = vld.sshfl [vmem:[#allocation1 + $0x10] sm:$0xff pattern:$0x75316420]  ;;  %343 = vst [vmem:[#allocation1] ss:$2 sm:$0xff] %v1209_v1 }
  0x5d   : > { %309 = vrot.lane.b32.xlu1 %v306_v18, %s1087_s6  ;;  %376 = vst [vmem:[#allocation1 + $0x10] ss:$2 sm:$0xff] %v371_v20 }
  0x5e   : > { %337 = vst [vmem:[#allocation3 + $0x48] sm:$0xf] %v333_v21 }
  0x5f   : > { %338 = vst [vmem:[#allocation3 + $0x28] sm:$0xf] %v334_v22 }
  0x63   : > { %v347_v25 = vld.sshfl [vmem:[#allocation1 + $0x8] sm:$0xff pattern:$0x75316420]  ;;  %v346_v26 = vld.sshfl [vmem:[#allocation1] sm:$0xff pattern:$0x75316420] }
  0x64   : > { %v379_v27 = vld.sshfl [vmem:[#allocation1 + $0x10] sm:$0xff pattern:$0x75316420]  ;;  %374 = vst [vmem:[#allocation1] ss:$2 sm:$0xff] %v1209_v1 }
  0x65   : > { %384 = vrot.lane.b32.xlu2 %v379_v27, %s1088_s7  ;;  %353 = vrot.lane.b32.xlu1 %v348_v23, %s1089_s8  ;;  %402 = vst [vmem:[#allocation1 + $0x11] ss:$2 sm:$0xff] %v396_v24  ;;  %v1092_v27 = vmov 0  }
  0x66   : > { %983 = vset.pattern.permute.xlu0 %v1092_v27  ;;  %984 = vset.pattern.permute.xlu2 %v1092_v27 }
  0x6b   : > { %v377_v29 = vld.sshfl [vmem:[#allocation1] sm:$0xff pattern:$0x75316420]  ;;  %v378_v30 = vld.sshfl [vmem:[#allocation1 + $0x8] sm:$0xff pattern:$0x75316420] }
  0x6c   : > { %380 = vrot.lane.b32.xlu0 %v377_v29, %s1088_s7  ;;  %v405_v31 = vld.sshfl [vmem:[#allocation1 + $0x10] sm:$0xff pattern:$0x75316420]  ;;  %400 = vst [vmem:[#allocation1 + $0x1] ss:$2 sm:$0xff] %v1209_v1 }
  0x6d   : > { %351 = vrot.lane.b32.xlu1 %v347_v25, %s1089_s8  ;;  %349 = vrot.lane.b32.xlu2 %v346_v26, %s1089_s8  ;;  %425 = vst [vmem:[#allocation1 + $0x10] ss:$2 sm:$0xff] %v420_v28  ;;  %v454_v26 = vld [vmem:[%s1452_s2] sm:$0xf] }
  0x73   : > { %v404_v32 = vld.sshfl [vmem:[#allocation1 + $0x8] sm:$0xff pattern:$0x75316420]  ;;  %v403_v33 = vld.sshfl [vmem:[#allocation1] sm:$0xff pattern:$0x75316420] }
  0x74   : > { %v428_v34 = vld.sshfl [vmem:[#allocation1 + $0x10] sm:$0xff pattern:$0x75316420]  ;;  %423 = vst [vmem:[#allocation1] ss:$2 sm:$0xff] %v1209_v1 }
  0x75   : > { %382 = vrot.lane.b32.xlu2 %v378_v30, %s1088_s7  ;;  %433 = vrot.lane.b32.xlu0 %v428_v34, %s1090_s9 }
  0x76   : > { %408 = vrot.lane.b32.xlu1 %v404_v32, %s1091_s10 }
  0x7b   : > { %v427_v35 = vld.sshfl [vmem:[#allocation1 + $0x8] sm:$0xff pattern:$0x75316420]  ;;  %v426_v36 = vld.sshfl [vmem:[#allocation1] sm:$0xff pattern:$0x75316420] }
  0x7d   : > { %410 = vrot.lane.b32.xlu2 %v405_v31, %s1091_s10  ;;  %431 = vrot.lane.b32.xlu0 %v427_v35, %s1090_s9 }
  0x7e   : > { %406 = vrot.lane.b32.xlu1 %v403_v33, %s1091_s10 }
  0x85   : > { %259 = vrot.lane.b32.xlu2 %v1216_v9, %s1085_s23  ;;  %429 = vrot.lane.b32.xlu0 %v426_v36, %s1090_s9 }
  0x86   : > { %233 = vrot.lane.b32.xlu1 %v1213_v7, %s1084_s4 }
  0x8d   : > { %263 = vrot.lane.b32.xlu0 %v1218_v11, %s1085_s23 }
  0x95   : > { %457 = vperm.xlu0 %983, %v454_v26   ;;  %v686_v26 = vld [vmem:[#allocation2 + $0xc] sm:$0xf] }
  0x96   : > { %v1250_v39 = vpop.permute.xlu2 %235 }
  0x9e   : > { %v1252_v42 = vpop.permute.xlu2 %261 }
  0xa6   : > { %v287_v47 = vpop.permute.xlu2 %286 }
  0xad   : > { %v238_v44 = vpop.permute.xlu0 %237 }
  0xae   : > { %v241_v45 = vsel %vm239_vm0, %v1250_v39, %v238_v44 }
  0xaf   : > { %v245_v46 = vsel %vm1254_vm1, %v241_v45, 0.0 }
  0xb0   : > { %247 = vst [vmem:[#allocation3] sm:$0xf] %v245_v46 }
  0xbe   : > { %v285_v50 = vpop.permute.xlu1 %284 }
  0xbf   : > { %v385_v52 = vpop.permute.xlu2 %384  ;;  %v291_v53 = vsel %vm290_vm2, %v285_v50, %v287_v47  ;;  %v289_v54 = vpop.permute.xlu0 %288 }
  0xc0   : > { %v295_v55 = vsel %vm1262_vm3, %v291_v53, 0.0  ;;  %v292_v56 = vsel %vm290_vm2, %v287_v47, %v289_v54  ;;  %v219_v53 = vld [vmem:[%s1451_s1] sm:$0xf] }
  0xc1   : > { %297 = vst [vmem:[#allocation3 + $0x18] sm:$0xf] %v295_v55  ;;  %v296_v57 = vsel %vm1266_vm4, %v292_v56, 0.0 }
  0xc2   : > { %298 = vst [vmem:[#allocation3 + $0x10] sm:$0xf] %v296_v57 }
  0xc7   : > { %v314_v58 = vpop.permute.xlu1 %313  ;;  %v350_v59 = vpop.permute.xlu2 %349 }
  0xc8   : > { %v312_v60 = vpop.permute.xlu0 %311 }
  0xc9   : > { %v317_v61 = vsel %vm315_vm5, %v312_v60, %v314_v58 }
  0xca   : > { %v321_v62 = vsel %vm1254_vm1, %v317_v61, 0.0 }
  0xcb   : > { %v325_v63 = vrot.slane %v321_v62, 4 }
  0xcd   : > { %329 = vst [vmem:[#allocation3 + $0x10] sm:$0xf0] %v325_v63 }
  0xcf   : > { %v310_v2 = vpop.permute.xlu1 %309  ;;  %v383_v3 = vpop.permute.xlu2 %382 }
  0xd0   : > { %v316_v4 = vsel %vm315_vm5, %v310_v2, %v312_v60  ;;  %v388_v5 = vsel %vm386_vm7, %v383_v3, %v385_v52 }
  0xd1   : > { %v320_v6 = vsel %vm1279_vm6, %v316_v4, 0.0  ;;  %v392_v7 = vsel %vm1254_vm1, %v388_v5, 0.0 }
  0xd2   : > { %v324_v8 = vrot.slane %v320_v6, 4  ;;  %394 = vst [vmem:[#allocation3 + $0x20] sm:$0xf] %v392_v7 }
  0xd4   : > { %328 = vst [vmem:[#allocation3 + $0x18] sm:$0xf0] %v324_v8 }
  0xd7   : > { %v354_v9 = vpop.permute.xlu1 %353  ;;  %v411_v10 = vpop.permute.xlu2 %410 }
  0xdb   : > { %v446_v52 = vld [vmem:[#allocation3 + $0x18] sm:$0xff] }
  0xde   : > { %v381_v11 = vpop.permute.xlu0 %380 }
  0xdf   : > { %v352_v12 = vpop.permute.xlu1 %351  ;;  %v260_v13 = vpop.permute.xlu2 %259  ;;  %v387_v14 = vsel %vm386_vm7, %v381_v11, %v383_v3 }
  0xe0   : > { %v356_v15 = vsel %vm355_vm8, %v350_v59, %v352_v12  ;;  %v357_v16 = vsel %vm355_vm8, %v352_v12, %v354_v9  ;;  %v266_v17 = vsel %vm265_vm9, %v260_v13, %v1252_v42  ;;  %v391_v18 = vsel %vm1279_vm6, %v387_v14, 0.0 }
  0xe1   : > { %v360_v19 = vsel %vm1262_vm3, %v356_v15, 0.0  ;;  %v361_v20 = vsel %vm1266_vm4, %v357_v16, 0.0  ;;  %270 = vst [vmem:[#allocation3 + $0x30] sm:$0xf0] %v266_v17  ;;  %v632_v16 = vld [vmem:[#allocation2 + $0xc] sm:$0xf] }
  0xe2   : > { %v364_v21 = vrot.slane %v360_v19, 4  ;;  %v365_v22 = vrot.slane %v361_v20, 4  ;;  %393 = vst [vmem:[#allocation3 + $0x8] sm:$0xf] %v391_v18  ;;  %v662_v20 = vld [vmem:[#allocation2 + $0xc] sm:$0xf] }
  0xe4   : > { %368 = vst [vmem:[#allocation3 + $0x48] sm:$0xf0] %v364_v21 }
  0xe5   : > { %369 = vst [vmem:[#allocation3 + $0x28] sm:$0xf0] %v365_v22 }
  0xe7   : > { %v434_v23 = vpop.permute.xlu0 %433 }
  0xe8   : > { %v409_v24 = vpop.permute.xlu1 %408 }
  0xe9   : > { %v414_v25 = vsel %vm412_vm10, %v409_v24, %v411_v10 }
  0xea   : > { %418 = vst [vmem:[#allocation3 + $0x20] sm:$0xf0] %v414_v25 }
  0xeb   : > { %v448_v50 = vld [vmem:[#allocation3 + $0x48] sm:$0xff] }
  0xec   : > { %v449_v44 = vld [vmem:[#allocation3 + $0x28] sm:$0xff] }
  0xef   : > { %v432_v28 = vpop.permute.xlu0 %431 }
  0xf0   : > { %v407_v29 = vpop.permute.xlu1 %406  ;;  %v437_v30 = vsel %vm435_vm11, %v432_v28, %v434_v23 }
  0xf1   : > { %v413_v31 = vsel %vm412_vm10, %v407_v29, %v409_v24  ;;  %v441_v32 = vsel %vm1266_vm4, %v437_v30, 0.0  ;;  %v451_v41 = vld [vmem:[#allocation3 + $0x20] sm:$0xff]  ;;  %v709_v30 = vld [vmem:[#allocation2 + $0xc] sm:$0xf] }
  0xf2   : > { %417 = vst [vmem:[#allocation3 + $0x8] sm:$0xf0] %v413_v31 }
  0xf3   : > { %443 = vst [vmem:[#allocation3 + $0x38] sm:$0xf] %v441_v32 }
  0xf7   : > { %v430_v33 = vpop.permute.xlu0 %429 }
  0xf8   : > { %v234_v34 = vpop.permute.xlu1 %233  ;;  %v436_v35 = vsel %vm435_vm11, %v430_v33, %v432_v28 }
  0xf9   : > { %v240_v36 = vsel %vm239_vm0, %v234_v34, %v1250_v39  ;;  %v440_v37 = vsel %vm1262_vm3, %v436_v35, 0.0  ;;  %v447_v39 = vld [vmem:[#allocation3 + $0x10] sm:$0xff]  ;;  %v450_v48 = vld [vmem:[#allocation3 + $0x8] sm:$0xff] }
  0xfa   : > { %v244_v38 = vsel %vm1279_vm6, %v240_v36, 0.0  ;;  %442 = vst [vmem:[#allocation3 + $0x40] sm:$0xf] %v440_v37  ;;  %v453_v40 = vld [vmem:[#allocation3 + $0x38] sm:$0xf] }
  0xfb   : > { %246 = vst [vmem:[#allocation3 + $0x30] sm:$0xf] %v244_v38  ;;  %912 = vmatpush.msk.msra.mxu1 %vm464_vm12, %v453_v40 }
  0xfd   : > { %503 = vmatpush.msra.mxu1 %v451_v41 }
  0xff   : > { %504 = vmatpush.msra.mxu1 %v449_v44  ;;  %v264_v45 = vpop.permute.xlu0 %263 }
 0x100   : > { %v267_v46 = vsel %vm265_vm9, %v1252_v42, %v264_v45 }
 0x101   : > { %271 = vst [vmem:[#allocation3] sm:$0xf0] %v267_v46  ;;  %505 = vmatpush.msra.mxu1 %v447_v39  ;;  %v452_v47 = vld [vmem:[#allocation3 + $0x40] sm:$0xf] }
 0x102   : > { %910 = vmatpush.msk.msra.mxu0 %vm464_vm12, %v452_v47  ;;  %v444_v42 = vld [vmem:[#allocation3 + $0x30] sm:$0xff] }
 0x104   : > { %483 = vmatpush.msra.mxu0 %v450_v48 }
 0x106   : > { %484 = vmatpush.msra.mxu0 %v448_v50 }
 0x107   : > { %v458_v55 = vpop.permute.xlu0 %457 }
 0x108   : > { %485 = vmatpush.msra.mxu0 %v446_v52  ;;  %v445_v54 = vld [vmem:[#allocation3] sm:$0xff] }
 0x109   : > { %506 = vmatpush.msra.mxu1 %v445_v54 }
 0x10a   : > { %486 = vmatpush.msra.mxu0 %v444_v42  ;;  %913 = vmatmul.msk.f32.vlgmr.msra.gmra.mxu1 %vm460_vm13, %v219_v53 }
 0x10b   : > { %911 = vmatmul.msk.f32.vlgmr.msra.gmra.mxu0 %vm460_vm13, %v219_v53 }
 0x187   : > { %v508_v56 = vpop.f32.mrf.mxu1 }
 0x188   : > { %v509_v57 = vadd.f32 %v508_v56, %v458_v55  ;;  %v488_v58 = vpop.f32.mrf.mxu0 }
 0x189   : > { %v489_v59 = vadd.f32 %v488_v58, %v458_v55 }
 0x18a   : > { %v512_v60 = vmax.f32 %v509_v57, 0.0 }
 0x18b   : > { %v511_v61 = vmax.f32 %v489_v59, 0.0 }
 0x18c   : > { %v517_v62 = vrot.slane %v512_v60, 4 }
 0x18e   : > { %v1325_v63 = vsel %vm464_vm12, %v511_v61, %v517_v62 }
 0x18f   : > { %520 = vst [vmem:[#allocation2 + $0x4] sm:$0xff] %v1325_v63 }
 0x196   : > { %v521_v2 = vld [vmem:[#allocation2] sm:$0xff]  ;;  %v522_v3 = vld [vmem:[#allocation2 + $0x8] sm:$0xf] }
 0x197   : > { %525 = vst [vmem:[#allocation1] ss:$2 sm:$0xff] %v521_v2  ;;  %v546_v4 = vld [vmem:[#allocation2 + $0x8] sm:$0xf] }
 0x198   : > { %527 = vst [vmem:[#allocation1 + $0x10] ss:$2 sm:$0xff] %v522_v3  ;;  %v569_v8 = vld [vmem:[#allocation2 + $0x8] sm:$0xf] }
 0x199   : > { %v593_v12 = vld [vmem:[#allocation2 + $0x8] sm:$0xf] }
 0x19e   : > { %v1328_v5 = vld.sshfl [vmem:[#allocation1] sm:$0xff pattern:$0x75316420]  ;;  %v529_v6 = vld.sshfl [vmem:[#allocation1 + $0x8] sm:$0xff pattern:$0x75316420] }
 0x19f   : > { %550 = vst [vmem:[#allocation1 + $0x1] ss:$2 sm:$0xff] %v521_v2  ;;  %v530_v7 = vld.sshfl [vmem:[#allocation1 + $0x10] sm:$0xff pattern:$0x75316420]  ;;  %533 = vrot.lane.b32.xlu1 %v529_v6, %s1084_s4 }
 0x1a0   : > { %535 = vrot.lane.b32.xlu2 %v530_v7, %s1084_s4  ;;  %552 = vst [vmem:[#allocation1 + $0x11] ss:$2 sm:$0xff] %v546_v4 }
 0x1a6   : > { %v1332_v9 = vld.sshfl [vmem:[#allocation1] sm:$0xff pattern:$0x75316420]  ;;  %v554_v10 = vld.sshfl [vmem:[#allocation1 + $0x8] sm:$0xff pattern:$0x75316420] }
 0x1a7   : > { %572 = vst [vmem:[#allocation1] ss:$2 sm:$0xff] %v521_v2  ;;  %v555_v11 = vld.sshfl [vmem:[#allocation1 + $0x10] sm:$0xff pattern:$0x75316420] }
 0x1a8   : > { %574 = vst [vmem:[#allocation1 + $0x10] ss:$2 sm:$0xff] %v569_v8 }
 0x1ae   : > { %v575_v13 = vld.sshfl [vmem:[#allocation1] sm:$0xff pattern:$0x75316420]  ;;  %v576_v14 = vld.sshfl [vmem:[#allocation1 + $0x8] sm:$0xff pattern:$0x75316420] }
 0x1af   : > { %596 = vst [vmem:[#allocation1] ss:$2 sm:$0xff] %v521_v2  ;;  %v577_v15 = vld.sshfl [vmem:[#allocation1 + $0x10] sm:$0xff pattern:$0x75316420]  ;;  %580 = vrot.lane.b32.xlu1 %v576_v14, %s1086_s5  ;;  %578 = vrot.lane.b32.xlu0 %v575_v13, %s1086_s5 }
 0x1b0   : > { %582 = vrot.lane.b32.xlu2 %v577_v15, %s1086_s5  ;;  %598 = vst [vmem:[#allocation1 + $0x10] ss:$2 sm:$0xff] %v593_v12 }
 0x1b6   : > { %v599_v17 = vld.sshfl [vmem:[#allocation1] sm:$0xff pattern:$0x75316420]  ;;  %v600_v18 = vld.sshfl [vmem:[#allocation1 + $0x8] sm:$0xff pattern:$0x75316420] }
 0x1b7   : > { %624 = vst [vmem:[#allocation1] ss:$2 sm:$0xff] %v1325_v63  ;;  %v601_v19 = vld.sshfl [vmem:[#allocation1 + $0x10] sm:$0xff pattern:$0x75316420] }
 0x1b8   : > { %606 = vrot.lane.b32.xlu0 %v601_v19, %s1087_s6  ;;  %604 = vrot.lane.b32.xlu2 %v600_v18, %s1087_s6  ;;  %637 = vst [vmem:[#allocation1 + $0x10] ss:$2 sm:$0xff] %v632_v16 }
 0x1be   : > { %v625_v21 = vld.sshfl [vmem:[#allocation1] sm:$0xff pattern:$0x75316420]  ;;  %v626_v22 = vld.sshfl [vmem:[#allocation1 + $0x8] sm:$0xff pattern:$0x75316420] }
 0x1bf   : > { %635 = vst [vmem:[#allocation1] ss:$2 sm:$0xff] %v1325_v63  ;;  %v640_v23 = vld.sshfl [vmem:[#allocation1 + $0x10] sm:$0xff pattern:$0x75316420] }
 0x1c0   : > { %629 = vst [vmem:[#allocation3 + $0x48] sm:$0xf] %v625_v21  ;;  %645 = vrot.lane.b32.xlu2 %v640_v23, %s1089_s8  ;;  %602 = vrot.lane.b32.xlu0 %v599_v17, %s1087_s6 }
 0x1c1   : > { %630 = vst [vmem:[#allocation3 + $0x28] sm:$0xf] %v626_v22 }
 0x1c2   : > { %667 = vst [vmem:[#allocation1 + $0x10] ss:$2 sm:$0xff] %v662_v20 }
 0x1c6   : > { %v638_v24 = vld.sshfl [vmem:[#allocation1] sm:$0xff pattern:$0x75316420]  ;;  %v639_v25 = vld.sshfl [vmem:[#allocation1 + $0x8] sm:$0xff pattern:$0x75316420] }
 0x1c7   : > { %643 = vrot.lane.b32.xlu1 %v639_v25, %s1089_s8  ;;  %665 = vst [vmem:[#allocation1] ss:$2 sm:$0xff] %v1325_v63 }
 0x1c9   : > { %v670_v27 = vld.sshfl [vmem:[#allocation1 + $0x10] sm:$0xff pattern:$0x75316420] }
 0x1ca   : > { %692 = vst [vmem:[#allocation1 + $0x11] ss:$2 sm:$0xff] %v686_v26 }
 0x1ce   : > { %v669_v28 = vld.sshfl [vmem:[#allocation1 + $0x8] sm:$0xff pattern:$0x75316420]  ;;  %v668_v29 = vld.sshfl [vmem:[#allocation1] sm:$0xff pattern:$0x75316420] }
 0x1cf   : > { %675 = vrot.lane.b32.xlu1 %v670_v27, %s1088_s7  ;;  %673 = vrot.lane.b32.xlu0 %v669_v28, %s1088_s7  ;;  %690 = vst [vmem:[#allocation1 + $0x1] ss:$2 sm:$0xff] %v1325_v63 }
 0x1d0   : > { %671 = vrot.lane.b32.xlu2 %v668_v29, %s1088_s7  ;;  %s188_s7 = scalar_lea.vmem [#allocation7], %s908_s28  ;;  %s1035_s28 = scalar_lea.hbm %s1453_s3, 16 }
 0x1d1   : > { %v695_v31 = vld.sshfl [vmem:[#allocation1 + $0x10] sm:$0xff pattern:$0x75316420] }
 0x1d2   : > { %714 = vst [vmem:[#allocation1 + $0x10] ss:$2 sm:$0xff] %v709_v30 }
 0x1d6   : > { %v694_v32 = vld.sshfl [vmem:[#allocation1 + $0x8] sm:$0xff pattern:$0x75316420]  ;;  %v693_v33 = vld.sshfl [vmem:[#allocation1] sm:$0xff pattern:$0x75316420] }
 0x1d7   : > { %641 = vrot.lane.b32.xlu1 %v638_v24, %s1089_s8  ;;  %698 = vrot.lane.b32.xlu0 %v694_v32, %s1091_s10  ;;  %712 = vst [vmem:[#allocation1] ss:$2 sm:$0xff] %v1325_v63  ;;  %s828_s8 = sshll.u32 %s188_s7, 4  ;;  %s829_s8 = int_to_ptr.vmem [resolvable:$true] %s828_s8 }
 0x1d9   : > { %v717_v34 = vld.sshfl [vmem:[#allocation1 + $0x10] sm:$0xff pattern:$0x75316420] }
 0x1da   : > { %722 = vrot.lane.b32.xlu2 %v717_v34, %s1090_s9 }
 0x1de   : > { %v715_v35 = vld.sshfl [vmem:[#allocation1] sm:$0xff pattern:$0x75316420]  ;;  %v716_v36 = vld.sshfl [vmem:[#allocation1 + $0x8] sm:$0xff pattern:$0x75316420] }
 0x1df   : > { %700 = vrot.lane.b32.xlu1 %v695_v31, %s1091_s10  ;;  %696 = vrot.lane.b32.xlu0 %v693_v33, %s1091_s10  ;;  %799 = vst [vmem:[#allocation1] ss:$2 sm:$0xff] %v1209_v1 }
 0x1e2   : > { %718 = vrot.lane.b32.xlu2 %v715_v35, %s1090_s9 }
 0x1e7   : > { %531 = vrot.lane.b32.xlu0 %v1328_v5, %s1084_s4  ;;  %720 = vrot.lane.b32.xlu1 %v716_v36, %s1090_s9  ;;  %s926_s4 = sshll.u32 %s1134_s16, 3  ;;  %s815_s16 = scalar_lea.sflag [#allocation6], %s1199_s26 }
 0x1e8   : > { %s826_s6 = scalar_lea.hbm %s1453_s3, %s926_s4 }
 0x1e9   : > { %s830_s9 = sshll.u32 %s826_s6, 4  ;;  %s831_s9 = int_to_ptr.hbm [resolvable:$true] %s830_s9 }
 0x1ea   : > { %560 = vrot.lane.b32.xlu2 %v555_v11, %s1085_s23  ;;  %s1029_s10 = sshra.s32 %s831_s9, 4  ;;  %s1030_s10 = int_to_ptr.hbm [resolvable:$true] %s1029_s10 }
 0x1eb   : > { %s1031_s11 = scalar_lea.hbm %s1030_s10, 8  ;;  %p1036_p0 = scmp.lt.s32.totalorder %s1030_s10, %s1453_s3 }
 0x1ec   : > { %p1032_p6 = scmp.ne.s32.totalorder %s1030_s10, %s1031_s11  ;;  %p1037_p1 = scmp.lt.s32.totalorder %s1035_s28, %s1031_s11 }
 0x1ee   : > { %p1033_p9 = pnand %p1032_p6, %p1163_p11  ;;  %p1038_p3 = por %p1037_p1, %p1036_p0 }
 0x1ef   : > { %558 = vrot.lane.b32.xlu1 %v554_v10, %s1085_s23 }
 0x1f0   : > { %p1034_p13 = pneg %p1033_p9 }
 0x1f2   : > { %746 = vperm.xlu2 %984, %v915_v43   ;;  %p1039_p4 = pnand %p1038_p3, %p1034_p13 }
 0x1f7   : > { %556 = vrot.lane.b32.xlu1 %v1332_v9, %s1085_s23 }
 0x1fa   : > { %v536_v37 = vpop.permute.xlu2 %535 }
 0x20a   : > { %v583_v41 = vpop.permute.xlu2 %582 }
 0x211   : > { %v534_v38 = vpop.permute.xlu1 %533 }
 0x212   : > { %v538_v40 = vsel %vm239_vm0, %v534_v38, %v536_v37  ;;  %v605_v50 = vpop.permute.xlu2 %604 }
 0x213   : > { %v542_v1 = vsel %vm1254_vm1, %v538_v40, 0.0  ;;  %v914_v40 = vld [vmem:[%s1451_s1 + $0x4] sm:$0xf] }
 0x214   : > { %544 = vst [vmem:[#allocation3] sm:$0xf] %v542_v1 }
 0x21a   : > { %v646_v59 = vpop.permute.xlu2 %645 }
 0x221   : > { %v581_v44 = vpop.permute.xlu1 %580  ;;  %v579_v45 = vpop.permute.xlu0 %578 }
 0x222   : > { %v585_v46 = vsel %vm290_vm2, %v581_v44, %v583_v41  ;;  %v584_v39 = vsel %vm290_vm2, %v579_v45, %v581_v44 }
 0x223   : > { %v589_v47 = vsel %vm1266_vm4, %v585_v46, 0.0  ;;  %v588_v48 = vsel %vm1262_vm3, %v584_v39, 0.0  ;;  %v801_v46 = vld.sshfl [vmem:[#allocation1 + $0x8] sm:$0xff pattern:$0x75316420] }
 0x224   : > { %591 = vst [vmem:[#allocation3 + $0x10] sm:$0xf] %v589_v47 }
 0x225   : > { %590 = vst [vmem:[#allocation3 + $0x18] sm:$0xf] %v588_v48 }
 0x22a   : > { %v607_v52 = vpop.permute.xlu0 %606  ;;  %v672_v2 = vpop.permute.xlu2 %671 }
 0x22b   : > { %v609_v53 = vsel %vm315_vm5, %v605_v50, %v607_v52  ;;  %v800_v52 = vld.sshfl [vmem:[#allocation1] sm:$0xff pattern:$0x75316420] }
 0x22c   : > { %v613_v54 = vsel %vm1254_vm1, %v609_v53, 0.0 }
 0x22d   : > { %v617_v42 = vrot.slane %v613_v54, 4 }
 0x22f   : > { %621 = vst [vmem:[#allocation3 + $0x10] sm:$0xf0] %v617_v42 }
 0x232   : > { %v603_v55 = vpop.permute.xlu0 %602 }
 0x233   : > { %v608_v56 = vsel %vm315_vm5, %v603_v55, %v605_v50 }
 0x234   : > { %v612_v57 = vsel %vm1279_vm6, %v608_v56, 0.0  ;;  %v723_v14 = vpop.permute.xlu2 %722 }
 0x235   : > { %v616_v58 = vrot.slane %v612_v57, 4 }
 0x236   : > { %v735_v37 = vld [vmem:[#allocation3 + $0x10] sm:$0xff] }
 0x237   : > { %620 = vst [vmem:[#allocation3 + $0x18] sm:$0xf0] %v616_v58 }
 0x239   : > { %v644_v60 = vpop.permute.xlu1 %643 }
 0x23a   : > { %v648_v61 = vsel %vm355_vm8, %v644_v60, %v646_v59 }
 0x23b   : > { %v652_v62 = vsel %vm1266_vm4, %v648_v61, 0.0 }
 0x23c   : > { %v656_v63 = vrot.slane %v652_v62, 4  ;;  %v719_v19 = vpop.permute.xlu2 %718 }
 0x23e   : > { %660 = vst [vmem:[#allocation3 + $0x28] sm:$0xf0] %v656_v63  ;;  %v734_v36 = vld [vmem:[#allocation3 + $0x18] sm:$0xff] }
 0x241   : > { %v676_v3 = vpop.permute.xlu1 %675  ;;  %v674_v4 = vpop.permute.xlu0 %673 }
 0x242   : > { %v677_v5 = vsel %vm386_vm7, %v672_v2, %v674_v4  ;;  %v678_v6 = vsel %vm386_vm7, %v674_v4, %v676_v3 }
 0x243   : > { %v681_v7 = vsel %vm1279_vm6, %v677_v5, 0.0  ;;  %v682_v8 = vsel %vm1254_vm1, %v678_v6, 0.0 }
 0x244   : > { %683 = vst [vmem:[#allocation3 + $0x8] sm:$0xf] %v681_v7  ;;  %v561_v28 = vpop.permute.xlu2 %560 }
 0x245   : > { %684 = vst [vmem:[#allocation3 + $0x20] sm:$0xf] %v682_v8  ;;  %v737_v33 = vld [vmem:[#allocation3 + $0x28] sm:$0xff] }
 0x249   : > { %v642_v9 = vpop.permute.xlu1 %641  ;;  %v699_v10 = vpop.permute.xlu0 %698 }
 0x24a   : > { %v647_v11 = vsel %vm355_vm8, %v642_v9, %v644_v60 }
 0x24b   : > { %v651_v12 = vsel %vm1262_vm3, %v647_v11, 0.0 }
 0x24c   : > { %v655_v13 = vrot.slane %v651_v12, 4  ;;  %v747_v41 = vpop.permute.xlu2 %746 }
 0x24e   : > { %659 = vst [vmem:[#allocation3 + $0x48] sm:$0xf0] %v655_v13 }
 0x251   : > { %v701_v15 = vpop.permute.xlu1 %700  ;;  %v697_v16 = vpop.permute.xlu0 %696 }
 0x252   : > { %v703_v17 = vsel %vm412_vm10, %v699_v10, %v701_v15  ;;  %v702_v18 = vsel %vm412_vm10, %v697_v16, %v699_v10 }
 0x253   : > { %707 = vst [vmem:[#allocation3 + $0x20] sm:$0xf0] %v703_v17 }
 0x254   : > { %706 = vst [vmem:[#allocation3 + $0x8] sm:$0xf0] %v702_v18 }
 0x255   : > { %v736_v51 = vld [vmem:[#allocation3 + $0x48] sm:$0xff] }
 0x259   : > { %v532_v20 = vpop.permute.xlu0 %531  ;;  %v721_v21 = vpop.permute.xlu1 %720 }
 0x25a   : > { %v537_v22 = vsel %vm239_vm0, %v532_v20, %v534_v38  ;;  %v724_v23 = vsel %vm435_vm11, %v719_v19, %v721_v21  ;;  %v725_v24 = vsel %vm435_vm11, %v721_v21, %v723_v14  ;;  %v739_v49 = vld [vmem:[#allocation3 + $0x20] sm:$0xff] }
 0x25b   : > { %v541_v25 = vsel %vm1279_vm6, %v537_v22, 0.0  ;;  %v728_v26 = vsel %vm1262_vm3, %v724_v23, 0.0  ;;  %v729_v27 = vsel %vm1266_vm4, %v725_v24, 0.0  ;;  %v738_v0 = vld [vmem:[#allocation3 + $0x8] sm:$0xff] }
 0x25c   : > { %543 = vst [vmem:[#allocation3 + $0x30] sm:$0xf] %v541_v25 }
 0x25d   : > { %730 = vst [vmem:[#allocation3 + $0x40] sm:$0xf] %v728_v26 }
 0x25e   : > { %731 = vst [vmem:[#allocation3 + $0x38] sm:$0xf] %v729_v27 }
 0x261   : > { %v559_v29 = vpop.permute.xlu1 %558 }
 0x262   : > { %v563_v30 = vsel %vm265_vm9, %v559_v29, %v561_v28 }
 0x263   : > { %567 = vst [vmem:[#allocation3] sm:$0xf0] %v563_v30 }
 0x264   : > { %v740_v31 = vld [vmem:[#allocation3 + $0x40] sm:$0xf] }
 0x265   : > { %916 = vmatpush.msk.msra.mxu2 %vm464_vm12, %v740_v31  ;;  %v741_v32 = vld [vmem:[#allocation3 + $0x38] sm:$0xf] }
 0x266   : > { %918 = vmatpush.msk.msra.mxu3 %vm464_vm12, %v741_v32 }
 0x267   : > { %770 = vmatpush.msra.mxu2 %v738_v0 }
 0x268   : > { %790 = vmatpush.msra.mxu3 %v739_v49 }
 0x269   : > { %771 = vmatpush.msra.mxu2 %v736_v51  ;;  %v557_v34 = vpop.permute.xlu1 %556 }
 0x26a   : > { %791 = vmatpush.msra.mxu3 %v737_v33  ;;  %v562_v35 = vsel %vm265_vm9, %v557_v34, %v559_v29  ;;  %v733_v38 = vld [vmem:[#allocation3] sm:$0xff] }
 0x26b   : > { %566 = vst [vmem:[#allocation3 + $0x30] sm:$0xf0] %v562_v35  ;;  %772 = vmatpush.msra.mxu2 %v734_v36 }
 0x26c   : > { %792 = vmatpush.msra.mxu3 %v735_v37 }
 0x26e   : > { %793 = vmatpush.msra.mxu3 %v733_v38 }
 0x26f   : > { %919 = vmatmul.msk.f32.vlgmr.msra.gmra.mxu3 %vm460_vm13, %v914_v40 }
 0x272   : > { %v732_v1 = vld [vmem:[#allocation3 + $0x30] sm:$0xff] }
 0x273   : > { %773 = vmatpush.msra.mxu2 %v732_v1 }
 0x274   : > { %917 = vmatmul.msk.f32.vlgmr.msra.gmra.mxu2 %vm460_vm13, %v914_v40 }
 0x2f2   : > { %v795_v44 = vpop.f32.mrf.mxu3 }
 0x2f3   : > { %v796_v45 = vadd.f32 %v795_v44, %v747_v41 }
 0x2f5   : > { %v805_v39 = vadd.f32 %v801_v46, %v796_v45 }
 0x2f7   : > { %v775_v47 = vpop.f32.mrf.mxu2  ;;  %v807_v48 = vmax.f32 %v805_v39, 0.0 }
 0x2f8   : > { %v776_v50 = vadd.f32 %v775_v47, %v747_v41 }
 0x2f9   : > { %v810_v54 = vrot.slane %v807_v48, 4 }
 0x2fa   : > { %v804_v53 = vadd.f32 %v800_v52, %v776_v50 }
 0x2fc   : > { %v806_v42 = vmax.f32 %v804_v53, 0.0 }
 0x2fe   : > { %v811_v55 = vsel %vm464_vm12, %v806_v42, %v810_v54 }
 0x2ff   : > { %813 = vst [vmem:[%s188_s7] sm:$0xff] %v811_v55 }
 0x300   : > { %1042 = shalt.err (!%p1039_p4)
}
 0x301   : > { %929 = dma.vmem_to_hbm [thread:$0]  (%p1163_p11), %s829_s8, 128, %s831_s9, %s815_s16  }
 0x302 PF: > { %s842_s26 = sand.u32 1, %s1069_s12   ;;  %p1467_p7 = scmp.ge.s32.totalorder %s1081_s15, 2 }
 0x303   : > { %s843_s27 = scalar_lea.sflag [#allocation6], %s842_s26 }
 0x304   : > { %p936_p5 = pnand %p1467_p7, %p1167_p12 }
 0x306   : > { %p937_p8 = pneg %p936_p5 }
 0x308   : > { %1064 = dma.done.wait (%p937_p8), %s843_s27, 128  }
 0x309   : > { %1066 = vsyncadd (%p937_p8), %s843_s27, 4294967168  ;;  %p16_p10 = scmp.ge.s32.totalorder %s1138_s18, 4   ;;  %s1468_s12 = smov %s1073_s13 }
 0x30a   : > { %s1469_s13 = smov %s1077_s14  ;;  %s1470_s14 = smov %s1150_s21 }
 0x30b   : > { %s1471_s15 = smov %s1138_s18  ;;  %18 = sbr.rel (!%p16_p10) target bundleno = 5 (0x5), region = 99 }
 0x310   :  { %849 = vsyncpa [#allocation5], 1 }
 0x311   :  { %851 = vsyncpa [#allocation5 + $0x1], 1 }
 0x312   :  { %852 = vsyncpa [#allocation6], 1 }
 0x313   :  { %854 = vsyncpa [#allocation6 + $0x1], 1 }

</bundles_post_ra>
